<compile_context>
chip_gen: v7x
topology: tpu7x:2x2x1
jax: 0.10.0
libtpu: 0.0.40
codegen_flags: <defaults>
</compile_context>

<pallas_src>
import functools

import jax
import jax.numpy as jnp
from jax.experimental import pallas as pl
from jax.experimental.pallas import tpu as pltpu

EPS = 1e-5


def _round_up(n, m):
    return ((n + m - 1) // m) * m


def prenorm_kernel(x_ref, gamma_ref, beta_ref, w_ref, b_ref, o_ref, y_scr,
                   *, d_true):
    # Grid = (row tiles, output-column tiles); the column axis is innermost
    # and "arbitrary", so for a fixed row tile we see j = 0, 1, ... in order.
    j = pl.program_id(1)

    @pl.when(j == 0)
    def _():
        # x_ref: (tm, Dp) row tile. Columns >= d_true are zero-padded, so sums
        # over the padded axis equal sums over the true `dim` axis.
        x = x_ref[...].astype(jnp.float32)
        inv_d = 1.0 / d_true
        row_sum = jnp.sum(x, axis=-1, keepdims=True)
        row_sumsq = jnp.sum(x * x, axis=-1, keepdims=True)
        mean = row_sum * inv_d
        var = row_sumsq * inv_d - mean * mean        # biased variance (PyTorch)
        inv_std = jax.lax.rsqrt(var + EPS)

        # Fold gamma into the scale. gamma/beta are zero in padded columns, so
        # padded columns of y are exactly zero and contribute nothing to the
        # dot below.
        scale = inv_std * gamma_ref[...]
        y = (x - mean) * scale + beta_ref[...]       # (tm, Dp) f32
        y_scr[...] = y.astype(jnp.bfloat16)          # cache for all j

    # fn = Linear(D, D): bf16 MXU matmul with f32 accumulation, per column tile.
    out = jnp.dot(y_scr[...], w_ref[...], preferred_element_type=jnp.float32)
    out = out + b_ref[...]
    o_ref[...] = out.astype(o_ref.dtype)


@functools.partial(jax.jit, static_argnames=("tm", "tn"))
def prenorm(x, gamma, beta, w, b, *, tm=256, tn=512):
    """x: (B, S, D). Returns fn(LayerNorm(x)) with fn = Linear(D, D)."""
    B, S, D = x.shape
    rows = B * S

    # Lane-dense last dim: pad D up to a multiple of 128.
    Dp = _round_up(D, 128)
    # Large MXU-friendly row tile, but never bigger than the (padded) row count.
    tm = min(tm, _round_up(rows, 8))
    rows_p = _round_up(rows, tm)
    # Output-column tile (bounds W's VMEM footprint, e.g. on v7x's 64 MiB VMEM).
    tn = min(tn, Dp)
    Np = _round_up(Dp, tn)

    # Zero-pad everything (zeros are inert for both the LN stats and the dot).
    x2 = jnp.pad(x.reshape(rows, D), ((0, rows_p - rows), (0, Dp - D)))
    gamma2 = jnp.pad(gamma.astype(jnp.float32).reshape(1, D),
                     ((0, 0), (0, Dp - D)))
    beta2 = jnp.pad(beta.astype(jnp.float32).reshape(1, D),
                    ((0, 0), (0, Dp - D)))
    w_p = jnp.pad(w.astype(jnp.bfloat16), ((0, Dp - D), (0, Np - D)))
    b2 = jnp.pad(b.astype(jnp.float32).reshape(1, D), ((0, 0), (0, Np - D)))

    kernel = functools.partial(prenorm_kernel, d_true=float(D))

    out = pl.pallas_call(
        kernel,
        out_shape=jax.ShapeDtypeStruct((rows_p, Np), x.dtype),
        grid_spec=pltpu.PrefetchScalarGridSpec(
            num_scalar_prefetch=0,
            grid=(rows_p // tm, Np // tn),
            in_specs=[
                pl.BlockSpec((tm, Dp), lambda i, j: (i, 0)),   # x row tile
                pl.BlockSpec((1, Dp), lambda i, j: (0, 0)),    # gamma
                pl.BlockSpec((1, Dp), lambda i, j: (0, 0)),    # beta
                pl.BlockSpec((Dp, tn), lambda i, j: (0, j)),   # W column tile
                pl.BlockSpec((1, tn), lambda i, j: (0, j)),    # b column tile
            ],
            out_specs=pl.BlockSpec((tm, tn), lambda i, j: (i, j)),
            scratch_shapes=[pltpu.VMEM((tm, Dp), jnp.bfloat16)],
        ),
        compiler_params=pltpu.CompilerParams(
            # Column axis carries the cached normalized tile -> "arbitrary".
            dimension_semantics=("parallel", "arbitrary"),
            vmem_limit_bytes=48 << 20,
        ),
    )(x2, gamma2, beta2, w_p, b2)

    return out[:rows, :D].reshape(B, S, D)


def prenorm_reference(x, gamma, beta, w, b):
    mean = jnp.mean(x, axis=-1, keepdims=True)
    var = jnp.mean((x - mean) ** 2, axis=-1, keepdims=True)
    xhat = (x - mean) / jnp.sqrt(var + EPS)
    y = xhat * gamma + beta
    return y @ w + b


if __name__ == "__main__":
    B, S, D = 2, 8, 32
    key = jax.random.PRNGKey(0)
    kx, kw, kb = jax.random.split(key, 3)

    x = jax.random.normal(kx, (B, S, D), dtype=jnp.float32)

    # LayerNorm params: PyTorch default init (gamma=1, beta=0)
    gamma = jnp.ones((D,), dtype=jnp.float32)
    beta = jnp.zeros((D,), dtype=jnp.float32)

    # fn = Linear(D, D): deterministic synthetic weights
    w = jax.random.normal(kw, (D, D), dtype=jnp.float32) * (1.0 / jnp.sqrt(D))
    b = jax.random.normal(kb, (D,), dtype=jnp.float32) * 0.01

    out = prenorm(x, gamma, beta, w, b)
    out = jax.block_until_ready(out)

    ref = prenorm_reference(x, gamma, beta, w, b)
    assert out.shape == (B, S, D)
    # bf16 MXU path (f32 accumulation) -> loosened tolerance.
    assert jnp.allclose(out, ref, atol=2e-2, rtol=2e-2), (
        float(jnp.max(jnp.abs(out - ref))))

    print("KERNEL_OK")
</pallas_src>

<mosaic_0001>
module attributes {stable_mosaic.version = 11 : i64} {
  func.func @prenorm_kernel(%arg0: i32, %arg1: i32, %arg2: memref<16x128xf32, #tpu.memory_space<vmem>>, %arg3: memref<1x128xf32, #tpu.memory_space<vmem>>, %arg4: memref<1x128xf32, #tpu.memory_space<vmem>>, %arg5: memref<128x128xbf16, #tpu.memory_space<vmem>>, %arg6: memref<1x128xf32, #tpu.memory_space<vmem>>, %arg7: memref<16x128xf32, #tpu.memory_space<vmem>>, %arg8: memref<16x128xbf16, #tpu.memory_space<vmem>>) attributes {dimension_semantics = [#tpu.dimension_semantics<parallel>, #tpu.dimension_semantics<arbitrary>], iteration_bounds = array<i64: 1, 1>, scalar_prefetch = 0 : i64, scratch_operands = 1 : i64, tpu.core_type = #tpu.core_type<tc>, window_params = [{transform_indices = @transform_0, window_bounds = array<i64: 16, 128>}, {pipeline_mode = #tpu.pipeline_mode<synchronous>, transform_indices = @transform_1, window_bounds = array<i64: 1, 128>}, {pipeline_mode = #tpu.pipeline_mode<synchronous>, transform_indices = @transform_2, window_bounds = array<i64: 1, 128>}, {transform_indices = @transform_3, window_bounds = array<i64: 128, 128>}, {transform_indices = @transform_4, window_bounds = array<i64: 1, 128>}, {transform_indices = @transform_5, window_bounds = array<i64: 16, 128>}]} {
    %c0_i32 = arith.constant 0 : i32
    %0 = arith.cmpi eq, %arg1, %c0_i32 : i32
    %1 = arith.extui %0 : i1 to i32
    %c0_i32_0 = arith.constant 0 : i32
    %2 = arith.cmpi ne, %1, %c0_i32_0 : i32
    scf.if %2 {
      %c0_8 = arith.constant 0 : index
      %c0_9 = arith.constant 0 : index
      %10 = vector.load %arg2[%c0_8, %c0_9] : memref<16x128xf32, #tpu.memory_space<vmem>>, vector<16x128xf32>
      %cst_10 = arith.constant dense<0.000000e+00> : vector<16xf32>
      %11 = vector.multi_reduction <add>, %10, %cst_10 [1] : vector<16x128xf32> to vector<16xf32>
      %12 = vector.shape_cast %11 : vector<16xf32> to vector<16x1xf32>
      %13 = arith.mulf %10, %10 : vector<16x128xf32>
      %cst_11 = arith.constant dense<0.000000e+00> : vector<16xf32>
      %14 = vector.multi_reduction <add>, %13, %cst_11 [1] : vector<16x128xf32> to vector<16xf32>
      %15 = vector.shape_cast %14 : vector<16xf32> to vector<16x1xf32>
      %cst_12 = arith.constant 3.125000e-02 : f32
      %16 = vector.broadcast %cst_12 : f32 to vector<16x1xf32>
      %17 = arith.mulf %12, %16 : vector<16x1xf32>
      %cst_13 = arith.constant 3.125000e-02 : f32
      %18 = vector.broadcast %cst_13 : f32 to vector<16x1xf32>
      %19 = arith.mulf %15, %18 : vector<16x1xf32>
      %20 = arith.mulf %17, %17 : vector<16x1xf32>
      %21 = arith.subf %19, %20 : vector<16x1xf32>
      %cst_14 = arith.constant 9.99999974E-6 : f32
      %22 = vector.broadcast %cst_14 : f32 to vector<16x1xf32>
      %23 = arith.addf %21, %22 : vector<16x1xf32>
      %24 = math.rsqrt %23 : vector<16x1xf32>
      %c0_15 = arith.constant 0 : index
      %c0_16 = arith.constant 0 : index
      %25 = vector.load %arg3[%c0_15, %c0_16] : memref<1x128xf32, #tpu.memory_space<vmem>>, vector<1x128xf32>
      %26 = vector.broadcast %24 : vector<16x1xf32> to vector<16x128xf32>
      %27 = vector.broadcast %25 : vector<1x128xf32> to vector<16x128xf32>
      %28 = arith.mulf %26, %27 : vector<16x128xf32>
      %29 = vector.broadcast %17 : vector<16x1xf32> to vector<16x128xf32>
      %30 = arith.subf %10, %29 : vector<16x128xf32>
      %31 = arith.mulf %30, %28 : vector<16x128xf32>
      %c0_17 = arith.constant 0 : index
      %c0_18 = arith.constant 0 : index
      %32 = vector.load %arg4[%c0_17, %c0_18] : memref<1x128xf32, #tpu.memory_space<vmem>>, vector<1x128xf32>
      %33 = vector.broadcast %32 : vector<1x128xf32> to vector<16x128xf32>
      %34 = arith.addf %31, %33 : vector<16x128xf32>
      %35 = arith.truncf %34 : vector<16x128xf32> to vector<16x128xbf16>
      %c0_19 = arith.constant 0 : index
      %c0_20 = arith.constant 0 : index
      %36 = vector.load %arg8[%c0_19, %c0_20] : memref<16x128xbf16, #tpu.memory_space<vmem>>, vector<16x128xbf16>
      tpu.vector_store %arg8[%c0_19, %c0_20], %35 {strides = array<i32>} : memref<16x128xbf16, #tpu.memory_space<vmem>>, vector<16x128xbf16>,
    } else {
    }
    %c0 = arith.constant 0 : index
    %c0_1 = arith.constant 0 : index
    %3 = vector.load %arg8[%c0, %c0_1] : memref<16x128xbf16, #tpu.memory_space<vmem>>, vector<16x128xbf16>
    %c0_2 = arith.constant 0 : index
    %c0_3 = arith.constant 0 : index
    %4 = vector.load %arg5[%c0_2, %c0_3] : memref<128x128xbf16, #tpu.memory_space<vmem>>, vector<128x128xbf16>
    %cst = arith.constant dense<0.000000e+00> : vector<16x128xf32>
    %5 = tpu.matmul %3, %4, %cst {dimension_numbers = #tpu.dot_dimension_numbers<[1], [0], [0], [1], [0, 0, 1, 1], [], []>} : vector<16x128xbf16>, vector<128x128xbf16>, vector<16x128xf32> -> vector<16x128xf32>
    %c0_4 = arith.constant 0 : index
    %c0_5 = arith.constant 0 : index
    %6 = vector.load %arg6[%c0_4, %c0_5] : memref<1x128xf32, #tpu.memory_space<vmem>>, vector<1x128xf32>
    %7 = vector.broadcast %6 : vector<1x128xf32> to vector<16x128xf32>
    %8 = arith.addf %5, %7 : vector<16x128xf32>
    %c0_6 = arith.constant 0 : index
    %c0_7 = arith.constant 0 : index
    %9 = vector.load %arg7[%c0_6, %c0_7] : memref<16x128xf32, #tpu.memory_space<vmem>>, vector<16x128xf32>
    tpu.vector_store %arg7[%c0_6, %c0_7], %8 {strides = array<i32>} : memref<16x128xf32, #tpu.memory_space<vmem>>, vector<16x128xf32>,
    return
  }
  func.func @transform_0(%arg0: i32, %arg1: i32) -> (i32, i32) {
    %c0_i32 = arith.constant 0 : i32
    %c0_i32_0 = arith.constant 0 : i32
    return %arg0, %c0_i32 : i32, i32
  }
  func.func @transform_1(%arg0: i32, %arg1: i32) -> (i32, i32) {
    %c0_i32 = arith.constant 0 : i32
    %c0_i32_0 = arith.constant 0 : i32
    %c0_i32_1 = arith.constant 0 : i32
    return %c0_i32, %c0_i32_0 : i32, i32
  }
  func.func @transform_2(%arg0: i32, %arg1: i32) -> (i32, i32) {
    %c0_i32 = arith.constant 0 : i32
    %c0_i32_0 = arith.constant 0 : i32
    %c0_i32_1 = arith.constant 0 : i32
    return %c0_i32, %c0_i32_0 : i32, i32
  }
  func.func @transform_3(%arg0: i32, %arg1: i32) -> (i32, i32) {
    %c0_i32 = arith.constant 0 : i32
    %c0_i32_0 = arith.constant 0 : i32
    return %c0_i32, %arg1 : i32, i32
  }
  func.func @transform_4(%arg0: i32, %arg1: i32) -> (i32, i32) {
    %c0_i32 = arith.constant 0 : i32
    %c0_i32_0 = arith.constant 0 : i32
    return %c0_i32, %arg1 : i32, i32
  }
  func.func @transform_5(%arg0: i32, %arg1: i32) -> (i32, i32) {
    %c0_i32 = arith.constant 0 : i32
    return %arg0, %arg1 : i32, i32
  }
}

</mosaic_0001>

<bundles_post_ra>
// kernel: prenorm.1
= control target key start
LH: loop header
LB: loop body
LE: loop exit
PB: predicated region body
PF: predicated region fallthrough
CT: control target
= control target key end

     0   :  { %v246_v2 = vmov 0.0   ;;  %vm247_vm0 = vmmov 0   ;;  %s329_s0 = inlined_call_operand.vmem [shape: f32[16,128], index: 0, kind: input, shape index: {}]   ;;  %s330_s3 = inlined_call_operand.vmem [shape: bf16[128,128], index: 3, kind: input, shape index: {}]   ;;  %s331_s1 = inlined_call_operand.vmem [shape: f32[1,128], index: 1, kind: input, shape index: {}]   ;;  %s332_s2 = inlined_call_operand.vmem [shape: f32[1,128], index: 2, kind: input, shape index: {}]   ;;  %s333_s4 = inlined_call_operand.vmem [shape: f32[1,128], index: 4, kind: input, shape index: {}]   ;;  %s334_s5 = inlined_call_operand.vmem [shape: f32[16,128], index: 5, kind: output, shape index: {}]  }
   0x1   :  { %v25_v0 = vld [vmem:[%s329_s0] sm:$0xff]  ;;  %v284_v1 = vld [vmem:[%s329_s0 + $0x8] sm:$0xff]  ;;  %212 = vmatprep.subr.bf16.mxu0 %v246_v2  ;;  %v236_v7 = vld [vmem:[%s330_s3 + $0x10] sm:$0xff]   ;;  %228 = vmatprep.mubr.msk.bf16.mxu0 %vm247_vm0, %v246_v2 }
   0x2   :  { %27 = vadd.xlane.f32.xlu0 %v25_v0  ;;  %v31_v3 = vmul.f32 %v25_v0, %v25_v0  ;;  %v32_v4 = vmul.f32 %v284_v1, %v284_v1  ;;  %v234_v5 = vld [vmem:[%s330_s3] sm:$0xff]   ;;  %v235_v6 = vld [vmem:[%s330_s3 + $0x8] sm:$0xff]   ;;  %v237_v8 = vld [vmem:[%s330_s3 + $0x18] sm:$0xff]  }
   0x3   :  { %213 = vmatpush3.bf16.msra.mxu0 %v234_v5  ;;  %v238_v9 = vld [vmem:[%s330_s3 + $0x20] sm:$0xff]   ;;  %v239_v10 = vld [vmem:[%s330_s3 + $0x28] sm:$0xff]   ;;  %v240_v11 = vld [vmem:[%s330_s3 + $0x30] sm:$0xff]  }
   0x4   :  { %33 = vadd.xlane.f32.xlu1 %v31_v3  ;;  %214 = vmatprep.subr.bf16.mxu0 %v246_v2  ;;  %v241_v12 = vld [vmem:[%s330_s3 + $0x38] sm:$0xff]   ;;  %v192_v27 = vld [vmem:[%s331_s1] ss:$0 sm:$0xff] }
   0x5   :  { %v193_v35 = vld [vmem:[%s332_s2] ss:$0 sm:$0xff] }
   0x6   :  { %29 = vadd.xlane.f32.xlu0 %v284_v1  ;;  %v194_v40 = vld [vmem:[%s333_s4] ss:$0 sm:$0xff] }
   0x7   :  { %215 = vmatpush3.bf16.msra.mxu0 %v235_v6 }
   0x8   :  { %35 = vadd.xlane.f32.xlu1 %v32_v4  ;;  %216 = vmatprep.subr.bf16.mxu0 %v246_v2 }
   0xb   :  { %217 = vmatpush3.bf16.msra.mxu0 %v236_v7 }
   0xc   :  { %218 = vmatprep.subr.bf16.mxu0 %v246_v2 }
   0xf   :  { %219 = vmatpush3.bf16.msra.mxu0 %v237_v8 }
  0x10   :  { %220 = vmatprep.subr.bf16.mxu0 %v246_v2 }
  0x13   :  { %221 = vmatpush3.bf16.msra.mxu0 %v238_v9 }
  0x14   :  { %222 = vmatprep.subr.bf16.mxu0 %v246_v2 }
  0x17   :  { %223 = vmatpush3.bf16.msra.mxu0 %v239_v10 }
  0x18   :  { %224 = vmatprep.subr.bf16.mxu0 %v246_v2 }
  0x1b   :  { %225 = vmatpush3.bf16.msra.mxu0 %v240_v11 }
  0x1c   :  { %226 = vmatprep.subr.bf16.mxu0 %v246_v2 }
  0x1f   :  { %227 = vmatpush3.bf16.msra.mxu0 %v241_v12 }
  0x8f   :  { %v28_v13 = vpop.xlane.xlu0 %27 }
  0x90   :  { %v37_v14 = vmul.f32 0.03125, %v28_v13 }
  0x91   :  { %v34_v15 = vpop.xlane.xlu1 %33 }
  0x92   :  { %v41_v16 = vmul.f32 %v37_v14, %v37_v14  ;;  %v39_v17 = vmul.f32 0.03125, %v34_v15  ;;  %v58_v30 = vsub.f32 %v25_v0, %v37_v14 }
  0x93   :  { %v30_v18 = vpop.xlane.xlu0 %29 }
  0x94   :  { %v43_v19 = vsub.f32 %v39_v17, %v41_v16  ;;  %v38_v20 = vmul.f32 0.03125, %v30_v18 }
  0x95   :  { %v36_v21 = vpop.xlane.xlu1 %35 }
  0x96   :  { %v45_v22 = vadd.f32 1e-05, %v43_v19  ;;  %v42_v23 = vmul.f32 %v38_v20, %v38_v20  ;;  %v40_v24 = vmul.f32 0.03125, %v36_v21  ;;  %v59_v32 = vsub.f32 %v284_v1, %v38_v20 }
  0x98   :  { %242 = vrsqrt.f32 %v45_v22  ;;  %v44_v25 = vsub.f32 %v40_v24, %v42_v23 }
  0x9a   :  { %v46_v26 = vadd.f32 1e-05, %v44_v25 }
  0x9c   :  { %244 = vrsqrt.f32 %v46_v26 }
  0xa2   :  { %v243_v28 = vpop.eup %242 }
  0xa3   :  { %v56_v29 = vmul.f32 %v243_v28, %v192_v27 }
  0xa5   :  { %v60_v34 = vmul.f32 %v58_v30, %v56_v29 }
  0xa6   :  { %v245_v31 = vpop.eup %244 }
  0xa7   :  { %v57_v33 = vmul.f32 %v245_v31, %v192_v27  ;;  %v69_v37 = vadd.f32 %v193_v35, %v60_v34 }
  0xa9   :  { %v61_v36 = vmul.f32 %v59_v32, %v57_v33 }
  0xab   :  { %v70_v38 = vadd.f32 %v193_v35, %v61_v36 }
  0xad   :  { %v71_v39 = vpack.c.bf16 %v70_v38, %v69_v37 }
  0xaf   :  { %229 = vmatmul.mubr.bf16.vlgmr.msra.gmra.mrb[0].mxu0 %v71_v39 }
 0x182   :  { %v179_v41 = vpop.f32.mrb[0].mxu0 }
 0x183   :  { %v180_v42 = vadd.f32 %v194_v40, %v179_v41  ;;  %v230_v43 = vpop.f32.mrb[1].mxu0 }
 0x184   :  { %v182_v44 = vpop.f32.mrb[2].mxu0 }
 0x185   :  { %186 = vst [vmem:[%s334_s5] sm:$0xff] %v180_v42  ;;  %v183_v45 = vadd.f32 %v194_v40, %v182_v44  ;;  %v231_v46 = vpop.f32.mrb[3].mxu0 }
 0x187   :  { %187 = vst [vmem:[%s334_s5 + $0x8] sm:$0xff] %v183_v45 }

</bundles_post_ra>
